<compile_context>
chip_gen: v7x
topology: tpu7x:2x2x1
jax: 0.10.0
libtpu: 0.0.40
codegen_flags: <defaults>
</compile_context>

<pallas_src>
import math

import jax
import jax.numpy as jnp
from jax.experimental import pallas as pl
from jax.experimental.pallas import tpu as pltpu


# ---------------------------------------------------------------------------
# Kernel: out = x + pe  (pe broadcast over the leading batch-tile dim)
# ---------------------------------------------------------------------------
def _pe_add_kernel(x_ref, pe_ref, o_ref):
    x = x_ref[...].astype(jnp.float32)          # (bt, ts, D)  [no-op for f32]
    pe = pe_ref[...]                            # (ts, D), f32
    o_ref[...] = (x + pe[None, :, :]).astype(o_ref.dtype)


# ---------------------------------------------------------------------------
# PE table (identical math to the PyTorch module's __init__)
# ---------------------------------------------------------------------------
def _build_pe_table(S, D):
    position = jnp.arange(S, dtype=jnp.float32)[:, None]                   # (S, 1)
    div_term = jnp.exp(
        jnp.arange(0, D, 2, dtype=jnp.float32) * (-math.log(10000.0) / D)  # (D//2,)
    )
    ang = position * div_term                                              # (S, D//2)
    # interleave: even dims <- sin, odd dims <- cos
    return jnp.stack([jnp.sin(ang), jnp.cos(ang)], axis=-1).reshape(S, D)


# ---------------------------------------------------------------------------
# Tiling / VMEM-budget helpers
# ---------------------------------------------------------------------------
def _vmem_budget():
    """(per-buffer tile target bytes, vmem_limit_bytes) — generation aware."""
    cap = 0
    try:
        info = pltpu.get_tpu_info()
        cap = int(getattr(info, "vmem_capacity_bytes", 0) or 0)
    except Exception:
        cap = 0
    if cap >= 100 * 1024 * 1024:          # v5e / v6e: 128 MiB physical VMEM
        return 4 * 1024 * 1024, 64 * 1024 * 1024
    # v7x (64 MiB) or unknown: stay conservative so double-buffering survives.
    return 2 * 1024 * 1024, 32 * 1024 * 1024


def _pick_tiles(B, S, D, itemsize, target_bytes):
    """Choose (batch_tile, seq_tile) so one x block is ~target_bytes."""
    sub = max(8, 32 // itemsize)          # packed sublane multiple: f32 8, bf16 16, i8 32
    row_bytes = D * itemsize
    rows = max(1, target_bytes // row_bytes)
    if rows >= S:
        # Whole sequence fits: fold batch rows into the block (short-seq case).
        ts = S
        bt = max(1, min(B, int(target_bytes // max(1, S * row_bytes))))
        return bt, ts
    ts = max(sub, (rows // sub) * sub)    # sublane-aligned for this dtype
    return 1, min(ts, S)


# ---------------------------------------------------------------------------
# pallas_call wrapper
# ---------------------------------------------------------------------------
def _pe_add_call(x3, pe2, bt, ts, vmem_limit):
    B2, S2, D2 = x3.shape
    itemsize = jnp.dtype(x3.dtype).itemsize
    cost = pl.CostEstimate(
        flops=B2 * S2 * D2,                               # the add
        transcendentals=0,                                # PE table built outside
        bytes_accessed=2 * B2 * S2 * D2 * itemsize + S2 * D2 * 4,
    )
    return pl.pallas_call(
        _pe_add_kernel,
        out_shape=jax.ShapeDtypeStruct((B2, S2, D2), x3.dtype),
        grid=(pl.cdiv(S2, ts), pl.cdiv(B2, bt)),          # b innermost -> pe DMA elided
        in_specs=[
            pl.BlockSpec((bt, ts, D2), lambda s, b: (b, s, 0)),
            pl.BlockSpec((ts, D2), lambda s, b: (s, 0)),  # ignores b: reused across batch
        ],
        out_specs=pl.BlockSpec((bt, ts, D2), lambda s, b: (b, s, 0)),
        compiler_params=pltpu.CompilerParams(
            dimension_semantics=("parallel", "parallel"),
            vmem_limit_bytes=vmem_limit,
        ),
        cost_estimate=cost,
    )(x3, pe2)


def positional_encoding_add(x, max_len=5000):
    """x: (B, S, D) -> x + sinusoidal_pe[:S, :D]  (PyTorch PositionalEncoding.forward)."""
    B, S, D = x.shape
    assert D % 2 == 0, "embedding_dim must be even (as in the PyTorch module)"
    assert S <= max_len, "sequence length exceeds max_len"

    pe = _build_pe_table(S, D)                            # (S, D) f32, built once
    itemsize = jnp.dtype(x.dtype).itemsize
    target, limit = _vmem_budget()

    if D % 128 != 0 and (S * D) % 128 == 0:
        # Lane-dense view: fold (S, D) into rows of 128 lanes (contiguous, free
        # reshape) so stores are full-width vst even for small D.  The PE table
        # flattens identically, so the same broadcast-add kernel applies.
        rows = (S * D) // 128
        x3 = x.reshape(B, rows, 128)
        pe2 = pe.reshape(rows, 128)
        bt, tr = _pick_tiles(B, rows, 128, itemsize, target)
        out = _pe_add_call(x3, pe2, bt, tr, limit)
        return out.reshape(B, S, D)

    # General path: D is the lane axis (ideal when D % 128 == 0; still correct,
    # just masked stores, otherwise).
    bt, ts = _pick_tiles(B, S, D, itemsize, target)
    return _pe_add_call(x, pe, bt, ts, limit)


# ---------------------------------------------------------------------------
# Pure-JAX reference (replica of the PyTorch module) for verification
# ---------------------------------------------------------------------------
def _reference_pe_add(x):
    B, S, D = x.shape
    position = jnp.arange(S, dtype=jnp.float32)[:, None]
    div_term = jnp.exp(
        jnp.arange(0, D, 2, dtype=jnp.float32) * (-math.log(10000.0) / D)
    )
    pe = jnp.zeros((S, D), dtype=jnp.float32)
    pe = pe.at[:, 0::2].set(jnp.sin(position * div_term))
    pe = pe.at[:, 1::2].set(jnp.cos(position * div_term))
    return (x.astype(jnp.float32) + pe[None, :, :]).astype(x.dtype)


if __name__ == "__main__":
    key = jax.random.PRNGKey(0)

    # Shape 1: module-sized toy shape (D=32 -> lane-dense flat path, S*D%128==0)
    x1 = jax.random.normal(key, (2, 8, 32), dtype=jnp.float32)
    out1 = jax.block_until_ready(positional_encoding_add(x1))
    ref1 = _reference_pe_add(x1)
    assert out1.shape == x1.shape and out1.dtype == x1.dtype
    assert jnp.allclose(out1, ref1, atol=2e-5, rtol=1e-5), "mismatch (flat path)"

    # Shape 2: general path with batch folding (D=128, short sequence)
    x2 = jax.random.normal(jax.random.PRNGKey(1), (2, 16, 128), dtype=jnp.float32)
    out2 = jax.block_until_ready(positional_encoding_add(x2))
    ref2 = _reference_pe_add(x2)
    assert out2.shape == x2.shape and out2.dtype == x2.dtype
    assert jnp.allclose(out2, ref2, atol=2e-5, rtol=1e-5), "mismatch (seq path, D=128)"

    # Shape 3: general path, D not a multiple of 128 and S*D % 128 != 0 (masked lanes)
    x3 = jax.random.normal(jax.random.PRNGKey(2), (3, 10, 48), dtype=jnp.float32)
    out3 = jax.block_until_ready(positional_encoding_add(x3))
    ref3 = _reference_pe_add(x3)
    assert out3.shape == x3.shape and out3.dtype == x3.dtype
    assert jnp.allclose(out3, ref3, atol=2e-5, rtol=1e-5), "mismatch (seq path, D=48)"

    # Shape 4: bf16 input exercises dtype-aware sublane alignment and f32 accumulate
    x4 = jax.random.normal(jax.random.PRNGKey(3), (2, 8, 32), dtype=jnp.bfloat16)
    out4 = jax.block_until_ready(positional_encoding_add(x4))
    ref4 = _reference_pe_add(x4)
    assert out4.shape == x4.shape and out4.dtype == x4.dtype
    assert jnp.allclose(out4.astype(jnp.float32), ref4.astype(jnp.float32),
                        atol=2e-2, rtol=2e-2), "mismatch (bf16)"

    print("KERNEL_OK")
</pallas_src>

<mosaic_0001>
module attributes {stable_mosaic.version = 11 : i64} {
  func.func @_pe_add_kernel(%arg0: i32, %arg1: i32, %arg2: memref<2x2x128xf32, #tpu.memory_space<vmem>>, %arg3: memref<2x128xf32, #tpu.memory_space<vmem>>, %arg4: memref<2x2x128xf32, #tpu.memory_space<vmem>>) attributes {dimension_semantics = [#tpu.dimension_semantics<parallel>, #tpu.dimension_semantics<parallel>], iteration_bounds = array<i64: 1, 1>, scalar_prefetch = 0 : i64, scratch_operands = 0 : i64, tpu.core_type = #tpu.core_type<tc>, window_params = [{transform_indices = @transform_0, window_bounds = array<i64: 2, 2, 128>}, {transform_indices = @transform_1, window_bounds = array<i64: 2, 128>}, {transform_indices = @transform_2, window_bounds = array<i64: 2, 2, 128>}]} {
    %c0 = arith.constant 0 : index
    %c0_0 = arith.constant 0 : index
    %c0_1 = arith.constant 0 : index
    %0 = vector.load %arg2[%c0, %c0_0, %c0_1] : memref<2x2x128xf32, #tpu.memory_space<vmem>>, vector<2x2x128xf32>
    %c0_2 = arith.constant 0 : index
    %c0_3 = arith.constant 0 : index
    %1 = vector.load %arg3[%c0_2, %c0_3] : memref<2x128xf32, #tpu.memory_space<vmem>>, vector<2x128xf32>
    %2 = vector.shape_cast %1 : vector<2x128xf32> to vector<1x2x128xf32>
    %3 = vector.broadcast %2 : vector<1x2x128xf32> to vector<2x2x128xf32>
    %4 = arith.addf %0, %3 : vector<2x2x128xf32>
    %c0_4 = arith.constant 0 : index
    %c0_5 = arith.constant 0 : index
    %c0_6 = arith.constant 0 : index
    %5 = vector.load %arg4[%c0_4, %c0_5, %c0_6] : memref<2x2x128xf32, #tpu.memory_space<vmem>>, vector<2x2x128xf32>
    tpu.vector_store %arg4[%c0_4, %c0_5, %c0_6], %4 {strides = array<i32>} : memref<2x2x128xf32, #tpu.memory_space<vmem>>, vector<2x2x128xf32>,
    return
  }
  func.func @transform_0(%arg0: i32, %arg1: i32) -> (i32, i32, i32) {
    %c0_i32 = arith.constant 0 : i32
    %c0_i32_0 = arith.constant 0 : i32
    return %arg1, %arg0, %c0_i32 : i32, i32, i32
  }
  func.func @transform_1(%arg0: i32, %arg1: i32) -> (i32, i32) {
    %c0_i32 = arith.constant 0 : i32
    %c0_i32_0 = arith.constant 0 : i32
    return %arg0, %c0_i32 : i32, i32
  }
  func.func @transform_2(%arg0: i32, %arg1: i32) -> (i32, i32, i32) {
    %c0_i32 = arith.constant 0 : i32
    %c0_i32_0 = arith.constant 0 : i32
    return %arg1, %arg0, %c0_i32 : i32, i32, i32
  }
}

</mosaic_0001>

<bundles_post_ra>
// kernel: tpu_custom_call.1
= control target key start
LH: loop header
LB: loop body
LE: loop exit
PB: predicated region body
PF: predicated region fallthrough
CT: control target
= control target key end

     0   :  { %7 = vsyncpa [#allocation3], 0  ;;  %s154_s0 = inlined_call_operand.hbm [shape: f32[2,2,128], index: 0, kind: input, shape index: {}]   ;;  %s155_s1 = inlined_call_operand.vmem [shape: f32[2,128], index: 1, kind: input, shape index: {}]   ;;  %s156_s2 = inlined_call_operand.hbm [shape: f32[2,2,128], index: 2, kind: output, shape index: {}]  }
   0x1   :  { %8 = vsyncpa [#allocation4], 0  ;;  %s102_s9 = smov [#allocation2]   ;;  %s54_s13 = scalar_lea.hbm %s154_s0, 64 }
   0x2   :  { %s14_s10 = sshll.u32 %s102_s9, 4  ;;  %p55_p0 = scmp.ne.s32.totalorder %s154_s0, %s54_s13  ;;  %s15_s10 = int_to_ptr.vmem [resolvable:$true] %s14_s10 }
   0x3   :  { %p58_p1 = scmp.lt.u32.totalorder %s54_s13, %s154_s0 }
   0x5   :  { %p60_p2 = pnand %p58_p1, %p55_p0 }
   0x7   :  { %63 = shalt.err (!%p60_p2)
}
   0x8   :  { %s64_s18 = scalar_lea.vmem %s15_s10, 64  ;;  %p69_p4 = scmp.lt.s32.totalorder %s15_s10, %s15_s10 }
   0x9   :  { %p65_p3 = scmp.ne.s32.totalorder %s15_s10, %s64_s18  ;;  %p70_p5 = scmp.lt.s32.totalorder %s64_s18, %s64_s18 }
   0xb   :  { %p71_p6 = por %p70_p5, %p69_p4 }
   0xd   :  { %p72_p7 = pnand %p71_p6, %p65_p3 }
   0xf   :  { %75 = shalt.err (!%p72_p7)
}
  0x10   :  { %s103_s19 = smov 32   ;;  %s104_s20 = smov 2  }
  0x11   :  { %20 = dma.hbm_to_vmem [thread:$0]  %s154_s0, 64, %s15_s10, [#allocation3], %s103_s19, %s103_s19, %s104_s20  }
  0x12   :  { %98 = dma.done.wait [#allocation3], 64  }
  0x13   :  { %99 = vsyncadd [#allocation3], 4294967232  ;;  %s105_s23 = smov [#allocation5]   ;;  %v26_v0 = vld [vmem:[#allocation2] sm:$0x3] }
  0x14   :  { %s38_s24 = sshll.u32 %s105_s23, 4  ;;  %v28_v1 = vld [vmem:[%s155_s1] sm:$0x3]  ;;  %v27_v2 = vld [vmem:[#allocation2 + $0x2] sm:$0x3]  ;;  %s39_s24 = int_to_ptr.vmem [resolvable:$true] %s38_s24 }
  0x15   :  { %v29_v3 = vadd.f32 %v28_v1, %v26_v0  ;;  %v30_v4 = vadd.f32 %v28_v1, %v27_v2  ;;  %s76_s27 = scalar_lea.vmem %s39_s24, 64  ;;  %p81_p9 = scmp.lt.s32.totalorder %s39_s24, %s39_s24 }
  0x16   :  { %p77_p8 = scmp.ne.s32.totalorder %s39_s24, %s76_s27  ;;  %p82_p10 = scmp.lt.s32.totalorder %s76_s27, %s76_s27 }
  0x17   :  { %31 = vst [vmem:[#allocation5] sm:$0x3] %v29_v3  ;;  %32 = vst [vmem:[#allocation5 + $0x2] sm:$0x3] %v30_v4 }
  0x18   :  { %p83_p11 = por %p82_p10, %p81_p9 }
  0x1a   :  { %p84_p12 = pnand %p83_p11, %p77_p8 }
  0x1c   :  { %87 = shalt.err (!%p84_p12)
}
  0x1d   :  { %s88_s29 = scalar_lea.hbm %s156_s2, 64 }
  0x1e   :  { %p89_p13 = scmp.ne.s32.totalorder %s156_s2, %s88_s29  ;;  %p92_p0 = scmp.lt.u32.totalorder %s88_s29, %s156_s2 }
  0x20   :  { %p94_p1 = pnand %p92_p0, %p89_p13 }
  0x22   :  { %97 = shalt.err (!%p94_p1)
}
  0x23   :  { %44 = dma.vmem_to_hbm [thread:$0]  %s39_s24, 64, %s156_s2, [#allocation4], %s103_s19, %s103_s19, %s104_s20  }
  0x24   :  { %100 = dma.done.wait [#allocation4], 64  }
  0x25   :  { %101 = vsyncadd [#allocation4], 4294967232 }
  0x26   :  { %48 = vsyncpa [#allocation3], 1 }
  0x27   :  { %49 = vsyncpa [#allocation4], 1 }

</bundles_post_ra>
